<compile_context>
chip_gen: v5e
topology: v5e:2x2
jax: 0.10.0
libtpu: 0.0.40
codegen_flags: <defaults>
</compile_context>

<pallas_src>
import jax
import jax.numpy as jnp
from jax.experimental import pallas as pl
from jax.experimental.pallas import tpu as pltpu


def _linear_add_relu_kernel(x_ref, w_ref, b_ref, other_ref, o_ref):
    # x_ref: (M, K), w_ref: (K, N), b_ref: (1, N), other_ref/o_ref: (M, N)
    y = jnp.dot(x_ref[...], w_ref[...], preferred_element_type=jnp.float32)
    y = y + b_ref[...] + other_ref[...]
    o_ref[...] = jnp.maximum(y, 0.0).astype(o_ref.dtype)


def prepare_params(weight, bias):
    """One-time parameter prep: PyTorch (N, K) weight -> (K, N); bias -> (1, N)."""
    return weight.T, bias.reshape(1, -1)


def linear_add_relu(x, w_t, b2, other):
    """x: (M, K) f32, w_t: (K, N) f32 (pre-transposed), b2: (1, N), other: (M, N)."""
    M, _ = x.shape
    N = w_t.shape[1]

    vmem = pl.BlockSpec(memory_space=pltpu.MemorySpace.VMEM)
    return pl.pallas_call(
        _linear_add_relu_kernel,
        out_shape=jax.ShapeDtypeStruct((M, N), jnp.float32),
        in_specs=[vmem, vmem, vmem, vmem],
        out_specs=vmem,
        # `other` (input index 3) has the same shape/dtype as the output and is
        # only read once before the output is produced -> safe to alias.
        input_output_aliases={3: 0},
    )(x, w_t, b2, other)


if __name__ == "__main__":
    key = jax.random.PRNGKey(0)
    k_x, k_other, k_w, k_b = jax.random.split(key, 4)

    # Shapes implied by the module: x (16, 12), Linear(12 -> 16), other (16, 16)
    M, K, N = 16, 12, 16
    x = jax.random.normal(k_x, (M, K), dtype=jnp.float32)
    other = jax.random.normal(k_other, (M, N), dtype=jnp.float32)

    # Deterministic parameter init (PyTorch Linear default: U(-1/sqrt(K), 1/sqrt(K)))
    bound = 1.0 / (K ** 0.5)
    weight = jax.random.uniform(k_w, (N, K), minval=-bound, maxval=bound,
                                dtype=jnp.float32)
    bias = jax.random.uniform(k_b, (N,), minval=-bound, maxval=bound,
                              dtype=jnp.float32)

    # One-time (init-time) parameter layout prep — out of the hot call path.
    w_t, b2 = prepare_params(weight, bias)
    w_t, b2 = jax.block_until_ready((w_t, b2))

    out = linear_add_relu(x, w_t, b2, other)
    jax.block_until_ready(out)

    # Reference check in plain JAX
    ref = jnp.maximum(x @ weight.T + bias + other, 0.0)
    assert out.shape == (M, N)
    assert jnp.allclose(out, ref, atol=1e-5), "mismatch vs reference"

    print("KERNEL_OK")
</pallas_src>

<mosaic_0001>
module attributes {stable_mosaic.version = 11 : i64} {
  func.func @_linear_add_relu_kernel(%arg0: memref<16x12xf32, #tpu.memory_space<vmem>>, %arg1: memref<12x16xf32, #tpu.memory_space<vmem>>, %arg2: memref<1x16xf32, #tpu.memory_space<vmem>>, %arg3: memref<16x16xf32, #tpu.memory_space<vmem>>, %arg4: memref<16x16xf32, #tpu.memory_space<vmem>>) attributes {dimension_semantics = [], scalar_prefetch = 0 : i64, scratch_operands = 0 : i64, tpu.core_type = #tpu.core_type<tc>} {
    %c0 = arith.constant 0 : index
    %c0_0 = arith.constant 0 : index
    %0 = vector.load %arg0[%c0, %c0_0] : memref<16x12xf32, #tpu.memory_space<vmem>>, vector<16x12xf32>
    %c0_1 = arith.constant 0 : index
    %c0_2 = arith.constant 0 : index
    %1 = vector.load %arg1[%c0_1, %c0_2] : memref<12x16xf32, #tpu.memory_space<vmem>>, vector<12x16xf32>
    %cst = arith.constant dense<0.000000e+00> : vector<16x16xf32>
    %2 = tpu.matmul %0, %1, %cst {dimension_numbers = #tpu.dot_dimension_numbers<[1], [0], [0], [1], [0, 0, 1, 1], [], []>} : vector<16x12xf32>, vector<12x16xf32>, vector<16x16xf32> -> vector<16x16xf32>
    %c0_3 = arith.constant 0 : index
    %c0_4 = arith.constant 0 : index
    %3 = vector.load %arg2[%c0_3, %c0_4] : memref<1x16xf32, #tpu.memory_space<vmem>>, vector<1x16xf32>
    %4 = vector.broadcast %3 : vector<1x16xf32> to vector<16x16xf32>
    %5 = arith.addf %2, %4 : vector<16x16xf32>
    %c0_5 = arith.constant 0 : index
    %c0_6 = arith.constant 0 : index
    %6 = vector.load %arg3[%c0_5, %c0_6] : memref<16x16xf32, #tpu.memory_space<vmem>>, vector<16x16xf32>
    %7 = arith.addf %5, %6 : vector<16x16xf32>
    %cst_7 = arith.constant 0.000000e+00 : f32
    %8 = vector.broadcast %cst_7 : f32 to vector<16x16xf32>
    %9 = arith.maximumf %7, %8 : vector<16x16xf32>
    %c0_8 = arith.constant 0 : index
    %c0_9 = arith.constant 0 : index
    %10 = vector.load %arg4[%c0_8, %c0_9] : memref<16x16xf32, #tpu.memory_space<vmem>>, vector<16x16xf32>
    tpu.vector_store %arg4[%c0_8, %c0_9], %9 {strides = array<i32>} : memref<16x16xf32, #tpu.memory_space<vmem>>, vector<16x16xf32>,
    return
  }
}

</mosaic_0001>

<bundles_post_ra>
// kernel: tpu_custom_call.1
= control target key start
LH: loop header
LB: loop body
LE: loop exit
PB: predicated region body
PF: predicated region fallthrough
CT: control target
= control target key end

     0   :  { %9 = vsyncpa [#allocation3], 0  ;;  %s265_s0 = inlined_call_operand.vmem [shape: f32[16,12], index: 0, kind: input, shape index: {}]   ;;  %s266_s1 = inlined_call_operand.vmem [shape: f32[12,16], index: 1, kind: input, shape index: {}]   ;;  %s267_s2 = inlined_call_operand.hbm [shape: f32[1,16], index: 2, kind: input, shape index: {}]   ;;  %s268_s3 = inlined_call_operand.hbm [shape: f32[16,16], index: 3, kind: input, shape index: {}, may-alias: {3,4}]   ;;  %s269_s4 = inlined_call_operand.hbm [shape: f32[16,16], index: 4, kind: output, shape index: {}, may-alias: {3,4}]  }
   0x1   :  { %10 = vsyncpa [#allocation6], 0 }
   0x2   :  { %11 = vsyncpa [#allocation4], 0  ;;  %s21_s17 = sshll.u32 %s267_s2, 4  ;;  %s208_s18 = smov [#allocation2]   ;;  %s22_s17 = int_to_ptr.hbm [resolvable:$true] %s21_s17 }
   0x3   :  { %s23_s19 = sshll.u32 %s208_s18, 4  ;;  %s31_s22 = sshll.u32 %s268_s3, 4  ;;  %s24_s19 = int_to_ptr.vmem [resolvable:$true] %s23_s19  ;;  %s32_s22 = int_to_ptr.hbm [resolvable:$true] %s31_s22 }
   0x4   :  { %26 = dma.hbm_to_vmem [thread:$0]  %s22_s17, 16, %s24_s19, [#allocation3]  }
   0x5   :  { %s209_s23 = smov [#allocation5]   ;;  %s210_s25 = smov 128  }
   0x6   :  { %s33_s24 = sshll.u32 %s209_s23, 4  ;;  %s211_s26 = smov 8   ;;  %s34_s24 = int_to_ptr.vmem [resolvable:$true] %s33_s24 }
   0x7   :  { %39 = dma.hbm_to_vmem [thread:$0]  %s32_s22, 256, %s34_s24, [#allocation6], %s210_s25, %s210_s25, %s211_s26  }
   0x8   :  { %202 = dma.done.wait [#allocation3], 16  }
   0x9   :  { %203 = vsyncadd [#allocation3], 4294967280 }
   0xa   :  { %204 = dma.done.wait [#allocation6], 256  }
   0xb   :  { %205 = vsyncadd [#allocation6], 4294967040  ;;  %vm63_vm0 = vcmask 1043456   ;;  %v51_v0 = vld [vmem:[%s266_s1 + $0x8] sm:$0xf]  ;;  %v50_v1 = vld [vmem:[%s266_s1] sm:$0xff] }
   0xc   :  { %119 = vmatpush.msk.msra.mxu0 %vm63_vm0, %v51_v0  ;;  %122 = vmatpush.msk.msra.mxu1 %vm63_vm0, %v51_v0  ;;  %v48_v2 = vld [vmem:[%s265_s0] sm:$0xff]  ;;  %vm56_vm1 = vcmask 97280   ;;  %v49_v3 = vld [vmem:[%s265_s0 + $0x8] sm:$0xff]  ;;  %s212_s1 = smov [#allocation7]   ;;  %s105_s10 = sshll.u32 %s269_s4, 4  ;;  %vm96_vm2 = vcmask 130048   ;;  %s106_s10 = int_to_ptr.hbm [resolvable:$true] %s105_s10 }
   0xd   :  { %v129_v4 = vld [vmem:[#allocation2] ss:$0 sm:$0xff]  ;;  %v90_v6 = vld [vmem:[#allocation5] sm:$0xff]  ;;  %v91_v8 = vld [vmem:[#allocation5 + $0x8] sm:$0xff]  ;;  %s103_s7 = sshll.u32 %s212_s1, 4  ;;  %s104_s7 = int_to_ptr.vmem [resolvable:$true] %s103_s7 }
   0xe   :  { %82 = vmatpush.msra.mxu0 %v50_v1  ;;  %123 = vmatpush.msra.mxu1 %v50_v1 }
   0xf   :  { %120 = vmatmul.msk.f32.vlgmr.msra.gmra.mxu0 %vm56_vm1, %v48_v2  ;;  %121 = vmatmul.msk.f32.vlgmr.msra.gmra.mxu1 %vm56_vm1, %v49_v3 }
  0x8c   :  { %v84_v5 = vpop.f32.mrf.mxu0  ;;  %v87_v7 = vpop.f32.mrf.mxu1 }
  0x8d   :  { %v85_v9 = vadd.f32 %v129_v4, %v84_v5  ;;  %v88_v10 = vadd.f32 %v129_v4, %v87_v7 }
  0x8f   :  { %v92_v11 = vadd.f32 %v90_v6, %v85_v9  ;;  %v93_v12 = vadd.f32 %v91_v8, %v88_v10 }
  0x91   :  { %v94_v13 = vmax.f32 %v92_v11, 0.0  ;;  %v95_v14 = vmax.f32 %v93_v12, 0.0 }
  0x93   :  { %97 = vst.msk [vmem:[#allocation7] sm:$0xff] %vm96_vm2, %v94_v13 }
  0x94   :  { %98 = vst.msk [vmem:[#allocation7 + $0x8] sm:$0xff] %vm96_vm2, %v95_v14 }
  0x95   :  { %111 = dma.vmem_to_hbm [thread:$0]  %s104_s7, 256, %s106_s10, [#allocation4], %s210_s25, %s210_s25, %s211_s26  }
  0x96   :  { %206 = dma.done.wait [#allocation4], 256  }
  0x97   :  { %207 = vsyncadd [#allocation4], 4294967040 }
  0x98   :  { %116 = vsyncpa [#allocation3], 1 }
  0x99   :  { %117 = vsyncpa [#allocation6], 1 }
  0x9a   :  { %118 = vsyncpa [#allocation4], 1 }

</bundles_post_ra>
